<compile_context>
chip_gen: v5e
topology: v5e:2x2
jax: 0.10.0
libtpu: 0.0.40
codegen_flags: <defaults>
</compile_context>

<pallas_src>
import jax
import jax.numpy as jnp
from jax import lax
from jax.experimental import pallas as pl
from jax.experimental.pallas import tpu as pltpu


# ----------------------------------------------------------------------------
# Generation-aware sizing helpers.
# ----------------------------------------------------------------------------
def _sublane_multiple(dtype) -> int:
    # rows per 32-bit sublane word: 8 for f32, 16 for bf16, 32 for int8/fp8.
    return max(8, 32 // max(1, jnp.dtype(dtype).itemsize))


def _vmem_caps():
    """(physical VMEM bytes, max scoped-VMEM bytes we are willing to request)."""
    phys = 64 * 1024 * 1024
    try:
        phys = int(pltpu.get_tpu_info().vmem_capacity_bytes)
    except Exception:
        pass  # conservative default (v7x-sized) if the query is unavailable
    # Never request all of physical VMEM (double buffers / internal scratch need
    # headroom): <=100 MiB on 128 MiB parts (v5e/v6e), ~75% (=48 MiB) on v7x.
    return phys, int(min(100 * 1024 * 1024, (phys * 3) // 4))


def _vmem_limit(est_bytes, limit_cap):
    lo = min(16 * 1024 * 1024, limit_cap)
    return int(min(max(2 * est_bytes, lo), limit_cap))


def _pick_tile(total, row_bytes, dtype, target_bytes):
    """Largest divisor of `total` that is a multiple of the dtype's sublane
    packing (falling back to 8) and whose (tile, row) block is <= target_bytes.
    Final fallback is `total` itself (block == full dim is always legal)."""
    max_rows = max(8, int(target_bytes) // max(1, row_bytes))
    for step in (_sublane_multiple(dtype), 8):
        t = (min(max_rows, total) // step) * step
        while t >= step:
            if total % t == 0:
                return t
            t -= step
    return total


def _block_spec(block_shape, index_map, *, single_buffer=False):
    """BlockSpec helper; requests a single buffer for constant-index blocks."""
    buffered = getattr(pl, "Buffered", None)
    if single_buffer and buffered is not None:
        try:
            return pl.BlockSpec(block_shape, index_map, pipeline_mode=buffered(1))
        except TypeError:
            pass  # older jax: no pipeline_mode kwarg -> default double buffer
    return pl.BlockSpec(block_shape, index_map)


# ----------------------------------------------------------------------------
# Kernel 1: timestep is None -> broadcast-add of emb[0:L] over batch,
# tiled over (sequence-tile, batch) with batch innermost so the emb tile
# stays VMEM-resident across the batch loop.
# ----------------------------------------------------------------------------
def _add_pos_kernel(x_ref, emb_ref, o_ref):
    # x_ref/o_ref: (TL, D) (batch dim squeezed); emb_ref: (TL, D), same dtype.
    o_ref[...] = x_ref[...] + emb_ref[...]


def pos_embedding_forward(x, emb_table):
    """x: [B, L, D], emb_table: [S, D] with S >= L."""
    B, L, D = x.shape
    S = emb_table.shape[0]
    itemsize = x.dtype.itemsize

    _, limit_cap = _vmem_caps()
    # ~3 streams x 2 buffers per tile; keep them well inside the scoped limit.
    target = min(8 << 20, max(1 << 20, limit_cap // 12))
    TL = _pick_tile(L, D * itemsize, x.dtype, target)

    # Cast the table once in the wrapper (exact to output precision) and read the
    # needed rows straight through the BlockSpec unless that would violate the
    # sublane rule (ragged L), in which case slice to (L, D) == full block dims.
    emb_in = emb_table.astype(x.dtype) if emb_table.dtype != x.dtype else emb_table
    if not (TL % 8 == 0 or (TL == L and L == S)):
        emb_in = lax.slice(emb_in, (0, 0), (L, D))  # rare ragged fallback

    est = 2 * (2 * TL * D * itemsize) + 2 * TL * D * itemsize
    # NOTE: if D is not a multiple of 128 the writeback uses masked partial
    # stores (vst.msk); pad D in the caller for peak HBM bandwidth.
    return pl.pallas_call(
        _add_pos_kernel,
        out_shape=jax.ShapeDtypeStruct((B, L, D), x.dtype),
        # Batch innermost: the emb block index (s, 0) is constant across
        # consecutive grid steps, so the emb tile is fetched once per seq tile.
        grid=(L // TL, B),
        in_specs=[
            pl.BlockSpec((None, TL, D), lambda s, b: (b, s, 0)),
            pl.BlockSpec((TL, D), lambda s, b: (s, 0)),
        ],
        out_specs=pl.BlockSpec((None, TL, D), lambda s, b: (b, s, 0)),
        compiler_params=pltpu.CompilerParams(
            dimension_semantics=("parallel", "parallel"),
            vmem_limit_bytes=_vmem_limit(est, limit_cap),
        ),
    )(x, emb_in)


# ----------------------------------------------------------------------------
# Kernel 2: explicit timestep indices -> vectorized gather via one-hot matmul,
# S-tiled with an f32 accumulator so large tables never sit fully resident.
# ----------------------------------------------------------------------------
def _add_pos_ts_kernel(ts_ref, x_ref, emb_ref, o_ref, acc_ref):
    # ts_ref: (TL, 1) int32; x_ref/o_ref: (TL, D); emb_ref: (TS, D) table tile;
    # acc_ref: (TL, D) f32 accumulator, resident across the S-tile axis.
    k = pl.program_id(2)

    @pl.when(k == 0)
    def _():
        acc_ref[...] = jnp.zeros_like(acc_ref)

    TL = x_ref.shape[0]
    TS = emb_ref.shape[0]
    row_ids = k * TS + lax.broadcasted_iota(jnp.int32, (TL, TS), 1)
    # One-hot in the table's (== output's) dtype: entries are exactly 0/1, so the
    # MXU runs dtype-native (bf16 when activations are bf16) with f32 accumulate.
    # NOTE: out-of-range timestep rows give an all-zero one-hot (output == x),
    # unlike torch.nn.Embedding which raises; indices must lie in [0, S).
    onehot = (ts_ref[...] == row_ids).astype(emb_ref.dtype)             # (TL, TS) VPU
    acc_ref[...] += jnp.dot(onehot, emb_ref[...],
                            preferred_element_type=jnp.float32)          # (TL, D) MXU

    @pl.when(k == pl.num_programs(2) - 1)
    def _():
        o_ref[...] = x_ref[...] + acc_ref[...].astype(o_ref.dtype)


def pos_embedding_forward_timestep(x, emb_table, timestep):
    """x: [B, L, D], emb_table: [S, D], timestep: [B, L] int indices in [0, S)."""
    B, L, D = x.shape
    S = emb_table.shape[0]
    itemsize = x.dtype.itemsize

    _, limit_cap = _vmem_caps()
    TL = _pick_tile(L, D * itemsize, x.dtype,
                    min(4 << 20, max(1 << 20, limit_cap // 16)))

    # Cast the table once in the wrapper (exact to output precision).
    emb_in = emb_table.astype(x.dtype) if emb_table.dtype != x.dtype else emb_table

    # Tile the table axis so GPT-scale tables never have to be fully resident
    # (v7x has only 64 MiB VMEM); small tables use one single-buffered block.
    table_bytes = S * D * itemsize
    ts_budget = min(8 << 20, max(1 << 20, limit_cap // 8))
    TS = S if table_bytes <= ts_budget else _pick_tile(S, D * itemsize, x.dtype, ts_budget)
    n_s_tiles = S // TS
    # TODO(synk): if S has no sublane-aligned divisor under budget, _pick_tile
    # falls back to the full table (correct, but may exceed VMEM for huge S).

    # Per-position indices on the sublane axis (regular VMEM input, no SMEM pad).
    ts3 = timestep.astype(jnp.int32).reshape(B, L, 1)

    est = (2 * (2 * TL * D * itemsize)                       # x + out, double buffered
           + 2 * TL * 4                                      # timestep block
           + (1 if n_s_tiles == 1 else 2) * TS * D * itemsize  # table buffer(s)
           + 2 * TL * TS * 4                                 # iota + one-hot temporaries
           + TL * D * 4)                                     # f32 accumulator scratch
    return pl.pallas_call(
        _add_pos_ts_kernel,
        out_shape=jax.ShapeDtypeStruct((B, L, D), x.dtype),
        grid=(L // TL, B, n_s_tiles),
        in_specs=[
            pl.BlockSpec((None, TL, 1), lambda s, b, k: (b, s, 0)),
            pl.BlockSpec((None, TL, D), lambda s, b, k: (b, s, 0)),
            _block_spec((TS, D), lambda s, b, k: (k, 0),
                        single_buffer=(n_s_tiles == 1)),
        ],
        out_specs=pl.BlockSpec((None, TL, D), lambda s, b, k: (b, s, 0)),
        scratch_shapes=[pltpu.VMEM((TL, D), jnp.float32)],
        compiler_params=pltpu.CompilerParams(
            dimension_semantics=("parallel", "parallel", "arbitrary"),
            vmem_limit_bytes=_vmem_limit(est, limit_cap),
        ),
    )(ts3, x, emb_in)


# ----------------------------------------------------------------------------
# Module-like wrapper with deterministic parameter init.
# ----------------------------------------------------------------------------
class PosEmbedding:
    def __init__(self, embed_dim: int, seq_len: int, key):
        # torch.nn.Embedding default init ~ N(0, 1).
        self.embedding = jax.random.normal(key, (seq_len, embed_dim), jnp.float32)

    def __call__(self, x, timestep=None):
        if timestep is None:
            return pos_embedding_forward(x, self.embedding)
        return pos_embedding_forward_timestep(x, self.embedding, timestep)


if __name__ == "__main__":
    B, L, D, S = 2, 8, 32, 16   # batch, seq, embed_dim, seq_len (table size)

    key = jax.random.PRNGKey(0)
    k_emb, k_x, k_ts = jax.random.split(key, 3)

    module = PosEmbedding(embed_dim=D, seq_len=S, key=k_emb)
    x = jax.random.normal(k_x, (B, L, D), jnp.float32)

    # --- path 1: timestep=None ---
    out = jax.block_until_ready(module(x))
    ref = x + jnp.broadcast_to(module.embedding[:L][None, :, :], (B, L, D))
    assert out.shape == (B, L, D)
    assert jnp.allclose(out, ref, atol=1e-6), "timestep=None path mismatch"

    # --- path 2: explicit timestep indices ---
    timestep = jax.random.randint(k_ts, (B, L), 0, S, dtype=jnp.int32)
    out_ts = jax.block_until_ready(module(x, timestep))
    ref_ts = x + jnp.take(module.embedding, timestep, axis=0)
    assert jnp.allclose(out_ts, ref_ts, atol=1e-6), "timestep path mismatch"

    print("KERNEL_OK")
</pallas_src>

<mosaic_0001>
module attributes {stable_mosaic.version = 11 : i64} {
  func.func @_add_pos_kernel(%arg0: i32, %arg1: i32, %arg2: memref<1x8x32xf32, #tpu.memory_space<vmem>>, %arg3: memref<8x32xf32, #tpu.memory_space<vmem>>, %arg4: memref<1x8x32xf32, #tpu.memory_space<vmem>>) attributes {dimension_semantics = [#tpu.dimension_semantics<parallel>, #tpu.dimension_semantics<parallel>], iteration_bounds = array<i64: 1, 2>, scalar_prefetch = 0 : i64, scratch_operands = 0 : i64, tpu.core_type = #tpu.core_type<tc>, window_params = [{transform_indices = @transform_0, window_bounds = array<i64: 1, 8, 32>}, {transform_indices = @transform_1, window_bounds = array<i64: 8, 32>}, {transform_indices = @transform_2, window_bounds = array<i64: 1, 8, 32>}]} {
    %c0 = arith.constant 0 : index
    %c0_0 = arith.constant 0 : index
    %c0_1 = arith.constant 0 : index
    %0 = vector.load %arg2[%c0, %c0_0, %c0_1] : memref<1x8x32xf32, #tpu.memory_space<vmem>>, vector<1x8x32xf32>
    %1 = vector.shape_cast %0 : vector<1x8x32xf32> to vector<8x32xf32>
    %c0_2 = arith.constant 0 : index
    %c0_3 = arith.constant 0 : index
    %2 = vector.load %arg3[%c0_2, %c0_3] : memref<8x32xf32, #tpu.memory_space<vmem>>, vector<8x32xf32>
    %3 = arith.addf %1, %2 : vector<8x32xf32>
    %c0_4 = arith.constant 0 : index
    %c0_5 = arith.constant 0 : index
    %c0_6 = arith.constant 0 : index
    %4 = vector.load %arg4[%c0_4, %c0_5, %c0_6] : memref<1x8x32xf32, #tpu.memory_space<vmem>>, vector<1x8x32xf32>
    %5 = vector.shape_cast %4 : vector<1x8x32xf32> to vector<8x32xf32>
    %6 = vector.shape_cast %3 : vector<8x32xf32> to vector<1x8x32xf32>
    tpu.vector_store %arg4[%c0_4, %c0_5, %c0_6], %6 {strides = array<i32>} : memref<1x8x32xf32, #tpu.memory_space<vmem>>, vector<1x8x32xf32>,
    return
  }
  func.func @transform_0(%arg0: i32, %arg1: i32) -> (i32, i32, i32) {
    %c0_i32 = arith.constant 0 : i32
    %c0_i32_0 = arith.constant 0 : i32
    return %arg1, %arg0, %c0_i32 : i32, i32, i32
  }
  func.func @transform_1(%arg0: i32, %arg1: i32) -> (i32, i32) {
    %c0_i32 = arith.constant 0 : i32
    %c0_i32_0 = arith.constant 0 : i32
    return %arg0, %c0_i32 : i32, i32
  }
  func.func @transform_2(%arg0: i32, %arg1: i32) -> (i32, i32, i32) {
    %c0_i32 = arith.constant 0 : i32
    %c0_i32_0 = arith.constant 0 : i32
    return %arg1, %arg0, %c0_i32 : i32, i32, i32
  }
}

</mosaic_0001>

<bundles_post_ra>
// kernel: tpu_custom_call.1
= control target key start
LH: loop header
LB: loop body
LE: loop exit
PB: predicated region body
PF: predicated region fallthrough
CT: control target
= control target key end

     0   :  { %7 = vsyncpa [#allocation3], 0  ;;  %s715_s0 = inlined_call_operand.hbm [shape: f32[2,8,32], index: 0, kind: input, shape index: {}]   ;;  %s716_s1 = inlined_call_operand.hbm [shape: f32[16,32], index: 1, kind: input, shape index: {}]   ;;  %s717_s2 = inlined_call_operand.hbm [shape: f32[2,8,32], index: 2, kind: output, shape index: {}]  }
   0x1   :  { %9 = vsyncpa [#allocation3 + $0x1], 0 }
   0x2   :  { %10 = vsyncpa [#allocation6], 0 }
   0x3   :  { %11 = vsyncpa [#allocation4], 0 }
   0x4   :  { %13 = vsyncpa [#allocation4 + $0x1], 0  ;;  %s566_s9 = smov 0   ;;  %s568_s10 = smov 0  }
   0x5   :  { %s570_s11 = smov 0   ;;  %s572_s12 = smov 0  }
   0x6   :  { %s574_s13 = smov 0   ;;  %s576_s14 = smov 0  }
   0x7 LB: > { %s314_s15 = sadd.s32 4294967295, %s548_s14   ;;  %s315_s16 = sadd.s32 4294967294, %s548_s14   ;;  %s548_s14 = sphi %s576_s14, %s19_s14   ;;  %s544_s13 = sphi %s574_s13, %s729_s13   ;;  %s540_s12 = sphi %s572_s12, %s728_s12   ;;  %s536_s11 = sphi %s570_s11, %s727_s11   ;;  %s532_s10 = sphi %s568_s10, %s726_s10   ;;  %s528_s9 = sphi %s566_s9, %s725_s9  }
   0x8   : > { %p53_p0 = scmp.ne.s32.totalorder %s532_s10, %s528_s9  ;;  %p600_p1 = scmp.eq.s32.totalorder %s314_s15, 0 }
   0x9   : > { %p604_p2 = scmp.eq.s32.totalorder %s314_s15, 1  ;;  %p111_p3 = scmp.eq.s32.totalorder %s315_s16, 1 }
   0xa   : > { %p610_p4 = por %p600_p1, %p53_p0  ;;  %p316_p5 = scmp.ge.s32.totalorder %s548_s14, 1 }
   0xb   : > { %p615_p6 = por %p111_p3, %p53_p0  ;;  %p118_p7 = scmp.lt.s32.totalorder %s548_s14, 3 }
   0xc   : > { %s132_s23 = sshll.u32 %s716_s1, 4  ;;  %p318_p9 = scmp.ge.s32.totalorder %s548_s14, 2  ;;  %s133_s23 = int_to_ptr.hbm [resolvable:$true] %s132_s23 }
   0xd   : > { %p623_p8 = pnand %p316_p5, %p118_p7  ;;  %s550_s25 = smov [#allocation5]  }
   0xe   : > { %s134_s26 = sshll.u32 %s550_s25, 4  ;;  %s28_s27 = sadd.s32 1, %s544_s13  ;;  %s135_s26 = int_to_ptr.vmem [resolvable:$true] %s134_s26 }
   0xf   : > { %p337_p10 = pneg %p623_p8  ;;  %p29_p12 = scmp.ge.s32.totalorder %s28_s27, 2 }
  0x10   : > { %s40_s28 = sadd.s32 1, %s536_s11  ;;  %p47_p13 = scmp.ne.s32.totalorder %s536_s11, %s532_s10 }
  0x11   : > { %p338_p11 = pnand %p337_p10, %p600_p1  ;;  %p48_p0 = scmp.eq.s32.totalorder %s548_s14, 0 }
  0x12   : > { %s731_s27 = smov (%p29_p12, %s28_s27), 0  ;;  %p645_p5 = por %p604_p2, %p47_p13 }
  0x13   : > { %340 = dma.hbm_to_vmem [thread:$0]  (!%p338_p11), %s133_s23, 128, %s135_s26, [#allocation6]  }
  0x14   : > { %p639_p3 = por %p48_p0, %p47_p13  ;;  %s35_s3 = ssub.s32 %s544_s13, %s731_s27 }
  0x15   : > { %p350_p7 = scmp.lt.s32.totalorder %s548_s14, 2  ;;  %p38_p10 = scmp.eq.s32.totalorder %s35_s3, 0 }
  0x16   : > { %s145_s4 = sand.u32 1, %s536_s11   ;;  %s320_s7 = sshll.u32 %s544_s13, 3 }
  0x17   : > { %s319_s5 = sshll.u32 %s145_s4, 3  ;;  %s154_s16 = scalar_lea.hbm %s715_s0, %s320_s7 }
  0x18   : > { %s654_s6 = scalar_select %p38_p10, %s536_s11, %s40_s28  }
  0x19   : > { %s149_s21 = scalar_lea.vmem [#allocation2], %s319_s5  ;;  %s156_s18 = sshll.u32 %s154_s16, 4  ;;  %s157_s18 = int_to_ptr.hbm [resolvable:$true] %s156_s18 }
  0x1a   : > { %s158_s22 = sshll.u32 %s149_s21, 4  ;;  %p342_p2 = pnand %p350_p7, %p639_p3  ;;  %s159_s22 = int_to_ptr.vmem [resolvable:$true] %s158_s22 }
  0x1b   : > { %s146_s23 = scalar_lea.sflag [#allocation3], %s145_s4  ;;  %167 = sbr.rel (%p623_p8) target bundleno = 50 (0x32), region = 28 }
  0x1c   : > { %344 = dma.hbm_to_vmem [thread:$0]  (!%p342_p2), %s157_s18, 128, %s159_s22, %s146_s23  }
  0x1d   : > { %s665_s25 = sand.u32 (!%p623_p8), 1, %s532_s10  }
  0x1e   : > { %s322_s26 = sshll.u32 (!%p623_p8), %s665_s25, 3  ;;  %s170_s28 = scalar_lea.sflag (!%p623_p8), [#allocation3], %s665_s25 }
  0x1f   : > { %s173_s3 = scalar_lea.vmem (!%p623_p8), [#allocation2], %s322_s26 }
  0x20   : > { %515 = dma.done.wait (%p610_p4), %s170_s28, 128  }
  0x21   : > { %517 = vsyncadd (%p610_p4), %s170_s28, 4294967168 }
  0x22   : > { %519 = dma.done.wait (%p600_p1), [#allocation6], 128  }
  0x23   : > { %521 = vsyncadd (%p600_p1), [#allocation6], 4294967168  ;;  %s326_s24 = sshll.u32 %s540_s12, 3  ;;  %s199_s7 = scalar_lea.vmem [#allocation7], %s322_s26  ;;  %v200_v0 = vld [vmem:[%s173_s3] sm:$0xff]  ;;  %v201_v1 = vld [vmem:[#allocation5] sm:$0xff] }
  0x24   : > { %s217_s5 = scalar_lea.hbm %s717_s2, %s326_s24  ;;  %s219_s8 = sshll.u32 %s199_s7, 4  ;;  %vm203_vm0 = vcmask 261120   ;;  %v202_v2 = vadd.f32 %v201_v1, %v200_v0  ;;  %s220_s8 = int_to_ptr.vmem [resolvable:$true] %s219_s8 }
  0x25   : > { %s221_s15 = sshll.u32 %s217_s5, 4  ;;  %s206_s17 = scalar_lea.sflag [#allocation4], %s665_s25  ;;  %s222_s15 = int_to_ptr.hbm [resolvable:$true] %s221_s15 }
  0x26   : > { %204 = vst.msk [vmem:[%s199_s7] sm:$0xff] %vm203_vm0, %v202_v2  ;;  %s476_s19 = sshra.s32 %s222_s15, 4  ;;  %s482_s22 = scalar_lea.hbm %s717_s2, 16  ;;  %s477_s19 = int_to_ptr.hbm [resolvable:$true] %s476_s19 }
  0x27   : > { %s478_s16 = scalar_lea.hbm %s477_s19, 8  ;;  %p483_p11 = scmp.lt.s32.totalorder %s477_s19, %s717_s2 }
  0x28   : > { %p479_p1 = scmp.ne.s32.totalorder %s477_s19, %s478_s16  ;;  %p484_p12 = scmp.lt.s32.totalorder %s482_s22, %s478_s16 }
  0x2a   : > { %p480_p4 = pnand %p479_p1, %p645_p5  ;;  %p485_p13 = por %p484_p12, %p483_p11 }
  0x2c   : > { %p481_p8 = pneg %p480_p4 }
  0x2e   : > { %p486_p0 = pnand %p485_p13, %p481_p8 }
  0x30   : > { %489 = shalt.err (!%p486_p0)
}
  0x31   : > { %335 = dma.vmem_to_hbm [thread:$0]  (%p645_p5), %s220_s8, 128, %s222_s15, %s206_s17  }
  0x32 PF: > { %s233_s25 = sand.u32 1, %s528_s9   ;;  %p346_p3 = pnand %p318_p9, %p615_p6 }
  0x33   : > { %s234_s26 = scalar_lea.sflag [#allocation4], %s233_s25 }
  0x34   : > { %p347_p7 = pneg %p346_p3 }
  0x36   : > { %523 = dma.done.wait (%p347_p7), %s234_s26, 128  }
  0x37   : > { %525 = vsyncadd (%p347_p7), %s234_s26, 4294967168  ;;  %s19_s14 = sadd.s32 1, %s548_s14   ;;  %s725_s9 = smov %s532_s10 }
  0x38   : > { %p16_p10 = scmp.ge.s32.totalorder %s19_s14, 4   ;;  %s726_s10 = smov %s536_s11 }
  0x39   : > { %s727_s11 = smov %s654_s6  ;;  %s728_s12 = smov %s544_s13 }
  0x3a   : > { %s729_s13 = smov %s731_s27  ;;  %18 = sbr.rel (!%p16_p10) target bundleno = 7 (0x7), region = 78 }
  0x3f   :  { %240 = vsyncpa [#allocation3], 1 }
  0x40   :  { %242 = vsyncpa [#allocation3 + $0x1], 1 }
  0x41   :  { %243 = vsyncpa [#allocation6], 1 }
  0x42   :  { %244 = vsyncpa [#allocation4], 1 }
  0x43   :  { %246 = vsyncpa [#allocation4 + $0x1], 1 }

</bundles_post_ra>
